<compile_context>
chip_gen: v7x
topology: tpu7x:2x2x1
jax: 0.10.0
libtpu: 0.0.40
codegen_flags: <defaults>
</compile_context>

<pallas_src>
import functools

import numpy as np
import jax
import jax.numpy as jnp
from jax.experimental import pallas as pl
from jax.experimental.pallas import tpu as pltpu


def _spconv_kernel(x_ref, w_ref, cst_ref, a_ref, o_ref, *, H, W, C2, block_b):
    """Fused causal conv(3,2) + GroupNorm(1) + PReLU for `block_b` samples.

    x_ref  : (block_b, Cin, H*W)  input samples, spatial flattened on lanes
    w_ref  : (3*C2, 2*Cin)        kh-stacked / kw-K-stacked conv weights
                                  cols [0:Cin]    -> current column (kw=1)
                                  cols [Cin:2Cin] -> causal column  (kw=0)
    cst_ref: (C2, 3)              per-conv-channel [bias, gamma, beta]
    a_ref  : (1,) in SMEM         PReLU slope
    o_ref  : (block_b, C2, H*W)   pre-shuffle conv output, normalized+activated
    """
    HW = H * W
    Cin = x_ref.shape[1]

    w_full = w_ref[...]                 # (3*C2, 2*Cin)
    b_rows = cst_ref[:, 0:1]            # (C2, 1) conv bias
    g_rows = cst_ref[:, 1:2]            # (C2, 1) GroupNorm gamma (per conv ch)
    bt_rows = cst_ref[:, 2:3]           # (C2, 1) GroupNorm beta
    alpha = a_ref[0]                    # PReLU slope (scalar from SMEM)

    inv_cnt = 1.0 / float(C2 * HW)      # GroupNorm(1) reduces over C2*H*W values

    # Grid-step-invariant lane masks (W power-of-two -> mod lowers to an AND).
    # TODO(synk): for non-power-of-two W, precompute these masks wrapper-side.
    col_x = jax.lax.broadcasted_iota(jnp.int32, (Cin, HW), 1)
    w0_mask = (col_x % W) == 0
    col_c = jax.lax.broadcasted_iota(jnp.int32, (C2, HW), 1)
    up_ok = col_c >= W
    dn_ok = col_c < HW - W

    for s in range(block_b):            # static unroll over samples in the block
        x = x_ref[s]                                            # (Cin, HW)

        # Causal shift along W (kw=0 tap): xs[c,h,w] = x[c,h,w-1], 0 at w==0.
        xs = jnp.where(w0_mask, 0.0, pltpu.roll(x, shift=1, axis=1))

        # K-stack the two kw taps (2*Cin sublanes) -> single MXU matmul.
        xk = jnp.concatenate([x, xs], axis=0)                   # (2*Cin, HW)
        p = jnp.dot(w_full, xk,
                    preferred_element_type=jnp.float32,
                    precision=jax.lax.Precision.HIGHEST)        # (3*C2, HW)

        # Combine the kh taps by shifting the matmul *result* by +-W lanes
        # (+-1 row of H in the flattened layout), masking H-boundary rows.
        q0 = p[0:C2]               # kh = 0 -> contribution from input row h-1
        q1 = p[C2:2 * C2]          # kh = 1
        q2 = p[2 * C2:3 * C2]      # kh = 2 -> contribution from input row h+1
        conv = (q1 + b_rows
                + jnp.where(up_ok, pltpu.roll(q0, shift=W, axis=1), 0.0)
                + jnp.where(dn_ok, pltpu.roll(q2, shift=HW - W, axis=1), 0.0))

        # GroupNorm(num_groups=1): per-sample stats, single pass.  The sub-pixel
        # shuffle is a pure permutation, so stats over `conv` match the shuffled
        # tensor.  Clamp var at 0 against f32 cancellation.
        s1 = jnp.sum(conv)
        s2 = jnp.sum(conv * conv)
        mean = s1 * inv_cnt
        var = jnp.maximum(s2 * inv_cnt - mean * mean, 0.0)
        inv = jax.lax.rsqrt(var + 1e-8)
        scale = g_rows * inv                    # (C2, 1)
        offs = bt_rows - mean * scale           # (C2, 1)
        y = conv * scale + offs
        # PReLU with a single shared slope.
        y = jnp.where(y >= 0.0, y, alpha * y)

        o_ref[s] = y                            # one lane-dense (C2, HW) store


def _pick_block_b(N, max_b=8):
    """Batch block size: amortize per-step overhead, keep >=2 grid steps when
    N >= 2 (v7x has 2 TensorCores), and divide N exactly."""
    cap = max(N // 2, 1)
    for bb in range(min(max_b, cap), 0, -1):
        if N % bb == 0:
            return bb
    return 1


def spconv_forward(x, weight, bias, gamma, beta, prelu_a, *, scale_factor=2):
    """x: (N, Cin, H, W); weight: (out_ch*n, Cin, 3, 2); bias: (out_ch*n,);
    gamma/beta: (out_ch,); prelu_a: scalar.  Returns (N, out_ch, n*H, W)."""
    N, Cin, H, W = x.shape
    n = scale_factor
    C2 = weight.shape[0]
    out_ch = C2 // n
    assert weight.shape == (C2, Cin, 3, 2)
    HW = H * W

    # kh-stacked rows (kh*C2 + c2), kw K-stacked cols ([current | causal]).
    w_k1 = jnp.transpose(weight[:, :, :, 1], (2, 0, 1)).reshape(3 * C2, Cin)
    w_k0 = jnp.transpose(weight[:, :, :, 0], (2, 0, 1)).reshape(3 * C2, Cin)
    w_full = jnp.concatenate([w_k1, w_k0], axis=1).astype(jnp.float32)  # (3*C2, 2*Cin)

    # Per-conv-channel constants packed into one block: [bias, gamma, beta].
    # Conv channel c2 = c*n + i maps to output channel c = c2 // n.
    ch = np.arange(C2) // n
    cst = jnp.stack([bias.astype(jnp.float32),
                     gamma.astype(jnp.float32)[ch],
                     beta.astype(jnp.float32)[ch]], axis=1)             # (C2, 3)
    a1 = jnp.asarray(prelu_a, jnp.float32).reshape(1)

    x_flat = x.reshape(N, Cin, HW).astype(jnp.float32)  # free reshape (stays NCHW)

    block_b = _pick_block_b(N)
    kernel = functools.partial(_spconv_kernel, H=H, W=W, C2=C2, block_b=block_b)

    out_pre = pl.pallas_call(
        kernel,
        out_shape=jax.ShapeDtypeStruct((N, C2, HW), jnp.float32),
        grid_spec=pltpu.PrefetchScalarGridSpec(
            num_scalar_prefetch=0,
            grid=(N // block_b,),
            in_specs=[
                pl.BlockSpec((block_b, Cin, HW), lambda b: (b, 0, 0)),
                pl.BlockSpec((3 * C2, 2 * Cin), lambda b: (0, 0)),
                pl.BlockSpec((C2, 3), lambda b: (0, 0)),
                pl.BlockSpec(memory_space=pltpu.MemorySpace.SMEM),
            ],
            out_specs=pl.BlockSpec((block_b, C2, HW), lambda b: (b, 0, 0)),
        ),
        compiler_params=pltpu.CompilerParams(
            dimension_semantics=("parallel",),
            vmem_limit_bytes=32 * 1024 * 1024,
        ),
    )(x_flat, w_full, cst, a1)

    # Sub-pixel interleave as wrapper-side layout plumbing (tiny tensor):
    # out[b, c, n*h + i, w] = conv[b, c*n + i, h, w]
    out = out_pre.reshape(N, out_ch, n, H, W)
    out = jnp.transpose(out, (0, 1, 3, 2, 4)).reshape(N, out_ch, n * H, W)
    return out


def ref_spconv(x, w, b, gamma, beta, a, n=2, eps=1e-8):
    """Pure-numpy reference of the SPCONV forward pass."""
    N, Cin, H, W = x.shape
    C2 = w.shape[0]
    out_ch = C2 // n
    xp = np.pad(x.astype(np.float64), ((0, 0), (0, 0), (1, 1), (1, 0)))
    conv = np.zeros((N, C2, H, W), dtype=np.float64)
    for kh in range(3):
        for kw in range(2):
            patch = xp[:, :, kh:kh + H, kw:kw + W]
            conv += np.einsum('nchw,oc->nohw', patch, w[:, :, kh, kw].astype(np.float64))
    conv += b.reshape(1, C2, 1, 1)
    # sub-pixel shuffle: out[b, c, n*h+i, w] = conv[b, c*n+i, h, w]
    shuf = conv.reshape(N, out_ch, n, H, W).transpose(0, 1, 3, 2, 4).reshape(N, out_ch, n * H, W)
    mean = shuf.mean(axis=(1, 2, 3), keepdims=True)
    var = shuf.var(axis=(1, 2, 3), keepdims=True)          # biased, as in GroupNorm
    y = (shuf - mean) / np.sqrt(var + eps)
    y = y * gamma.reshape(1, out_ch, 1, 1) + beta.reshape(1, out_ch, 1, 1)
    return np.where(y >= 0, y, a * y).astype(np.float32)


if __name__ == "__main__":
    key = jax.random.PRNGKey(0)
    kx, kw, kb, kg, kbe, kx2 = jax.random.split(key, 6)

    Cin, H, W = 4, 16, 16
    out_ch, n = 4, 2
    C2 = out_ch * n

    weight = jax.random.normal(kw, (C2, Cin, 3, 2), dtype=jnp.float32) * 0.2
    bias = jax.random.normal(kb, (C2,), dtype=jnp.float32) * 0.1
    gamma = 1.0 + 0.1 * jax.random.normal(kg, (out_ch,), dtype=jnp.float32)
    beta = 0.1 * jax.random.normal(kbe, (out_ch,), dtype=jnp.float32)
    prelu_a = jnp.float32(0.25)

    fwd = jax.jit(spconv_forward, static_argnames=("scale_factor",))

    # Case 1: the module's nominal small shape (N=2 -> 2 grid steps, 1 sample/step).
    N = 2
    x = jax.random.normal(kx, (N, Cin, H, W), dtype=jnp.float32)
    out = jax.block_until_ready(fwd(x, weight, bias, gamma, beta, prelu_a, scale_factor=n))
    ref = ref_spconv(np.asarray(x), np.asarray(weight), np.asarray(bias),
                     np.asarray(gamma), np.asarray(beta), float(prelu_a), n=n)
    assert out.shape == (N, out_ch, n * H, W), out.shape
    np.testing.assert_allclose(np.asarray(out), ref, rtol=2e-3, atol=2e-3)

    # Case 2: larger batch exercising the batch-blocked path (N=8 -> 4 samples/step).
    N2 = 8
    x2 = jax.random.normal(kx2, (N2, Cin, H, W), dtype=jnp.float32)
    out2 = jax.block_until_ready(fwd(x2, weight, bias, gamma, beta, prelu_a, scale_factor=n))
    ref2 = ref_spconv(np.asarray(x2), np.asarray(weight), np.asarray(bias),
                      np.asarray(gamma), np.asarray(beta), float(prelu_a), n=n)
    assert out2.shape == (N2, out_ch, n * H, W), out2.shape
    np.testing.assert_allclose(np.asarray(out2), ref2, rtol=2e-3, atol=2e-3)

    print("KERNEL_OK")
</pallas_src>

<mosaic_0001>
module attributes {stable_mosaic.version = 11 : i64} {
  func.func @_spconv_kernel(%arg0: i32, %arg1: memref<1x4x256xf32, #tpu.memory_space<vmem>>, %arg2: memref<24x8xf32, #tpu.memory_space<vmem>>, %arg3: memref<8x3xf32, #tpu.memory_space<vmem>>, %arg4: memref<1xf32, #tpu.memory_space<smem>>, %arg5: memref<1x8x256xf32, #tpu.memory_space<vmem>>) attributes {dimension_semantics = [#tpu.dimension_semantics<parallel>], iteration_bounds = array<i64: 2>, scalar_prefetch = 0 : i64, scratch_operands = 0 : i64, tpu.core_type = #tpu.core_type<tc>, window_params = [{transform_indices = @transform_0, window_bounds = array<i64: 1, 4, 256>}, {pipeline_mode = #tpu.pipeline_mode<synchronous>, transform_indices = @transform_1, window_bounds = array<i64: 24, 8>}, {pipeline_mode = #tpu.pipeline_mode<synchronous>, transform_indices = @transform_2, window_bounds = array<i64: 8, 3>}, {transform_indices = @transform_3, window_bounds = array<i64: 1>}, {transform_indices = @transform_4, window_bounds = array<i64: 1, 8, 256>}]} {
    %c0 = arith.constant 0 : index
    %c0_0 = arith.constant 0 : index
    %0 = vector.load %arg2[%c0, %c0_0] : memref<24x8xf32, #tpu.memory_space<vmem>>, vector<24x8xf32>
    %c0_1 = arith.constant 0 : index
    %c0_2 = arith.constant 0 : index
    %1 = vector.load %arg3[%c0_1, %c0_2] : memref<8x3xf32, #tpu.memory_space<vmem>>, vector<8x1xf32>
    %c0_3 = arith.constant 0 : index
    %c1 = arith.constant 1 : index
    %2 = vector.load %arg3[%c0_3, %c1] : memref<8x3xf32, #tpu.memory_space<vmem>>, vector<8x1xf32>
    %c0_4 = arith.constant 0 : index
    %c2 = arith.constant 2 : index
    %3 = vector.load %arg3[%c0_4, %c2] : memref<8x3xf32, #tpu.memory_space<vmem>>, vector<8x1xf32>
    %c0_5 = arith.constant 0 : index
    %4 = memref.load %arg4[%c0_5] : memref<1xf32, #tpu.memory_space<smem>>
    %5 = tpu.iota {dimensions = array<i32: 1>} : vector<4x256xi32>
    %c16_i32 = arith.constant 16 : i32
    %c0_i32 = arith.constant 0 : i32
    %6 = arith.cmpi eq, %c16_i32, %c0_i32 : i32
    %c1_i32 = arith.constant 1 : i32
    %7 = arith.select %6, %c1_i32, %c16_i32 : i32
    %8 = vector.broadcast %7 : i32 to vector<4x256xi32>
    %9 = arith.remsi %5, %8 : vector<4x256xi32>
    %c0_i32_6 = arith.constant 0 : i32
    %10 = vector.broadcast %c0_i32_6 : i32 to vector<4x256xi32>
    %11 = arith.cmpi ne, %9, %10 : vector<4x256xi32>
    %c0_i32_7 = arith.constant 0 : i32
    %12 = vector.broadcast %c0_i32_7 : i32 to vector<4x256xi32>
    %13 = arith.cmpi slt, %9, %12 : vector<4x256xi32>
    %c0_i32_8 = arith.constant 0 : i32
    %14 = arith.cmpi slt, %7, %c0_i32_8 : i32
    %15 = vector.broadcast %14 : i1 to vector<4x256xi1>
    %16 = vector.broadcast %15 : vector<4x256xi1> to vector<4x256xi1>
    %17 = arith.xori %13, %16 : vector<4x256xi1>
    %18 = arith.andi %17, %11 : vector<4x256xi1>
    %19 = vector.broadcast %7 : i32 to vector<4x256xi32>
    %20 = arith.addi %9, %19 : vector<4x256xi32>
    %21 = arith.select %18, %20, %9 : vector<4x256xi1>, vector<4x256xi32>
    %c0_i32_9 = arith.constant 0 : i32
    %22 = vector.broadcast %c0_i32_9 : i32 to vector<4x256xi32>
    %23 = arith.cmpi eq, %21, %22 : vector<4x256xi32>
    %24 = tpu.iota {dimensions = array<i32: 1>} : vector<8x256xi32>
    %c16_i32_10 = arith.constant 16 : i32
    %25 = vector.broadcast %c16_i32_10 : i32 to vector<8x256xi32>
    %26 = arith.cmpi sge, %24, %25 : vector<8x256xi32>
    %c240_i32 = arith.constant 240 : i32
    %27 = vector.broadcast %c240_i32 : i32 to vector<8x256xi32>
    %28 = arith.cmpi slt, %24, %27 : vector<8x256xi32>
    %c0_11 = arith.constant 0 : index
    %c0_12 = arith.constant 0 : index
    %c0_13 = arith.constant 0 : index
    %29 = vector.load %arg1[%c0_11, %c0_12, %c0_13] : memref<1x4x256xf32, #tpu.memory_space<vmem>>, vector<1x4x256xf32>
    %30 = vector.shape_cast %29 : vector<1x4x256xf32> to vector<4x256xf32>
    %c1_i32_14 = arith.constant 1 : i32
    %31 = tpu.dynamic_rotate %30 by %c1_i32_14 dim 1 : vector<4x256xf32>, i32 -> vector<4x256xf32>
    %cst = arith.constant 0.000000e+00 : f32
    %32 = vector.broadcast %cst : f32 to vector<4x256xf32>
    %33 = arith.select %23, %32, %31 : vector<4x256xi1>, vector<4x256xf32>
    %34 = tpu.concatenate %30, %33 in 0 : vector<4x256xf32>, vector<4x256xf32> -> vector<8x256xf32>
    %cst_15 = arith.constant dense<0.000000e+00> : vector<24x256xf32>
    %35 = tpu.matmul %0, %34, %cst_15 {dimension_numbers = #tpu.dot_dimension_numbers<[1], [0], [0], [1], [0, 0, 1, 1], [], []>, precision = #tpu.contract_precision<fp32>} : vector<24x8xf32>, vector<8x256xf32>, vector<24x256xf32> -> vector<24x256xf32>
    %36 = vector.extract_strided_slice %35 {offsets = [0, 0], sizes = [8, 256], strides = [1, 1]} : vector<24x256xf32> to vector<8x256xf32>
    %37 = vector.extract_strided_slice %35 {offsets = [8, 0], sizes = [8, 256], strides = [1, 1]} : vector<24x256xf32> to vector<8x256xf32>
    %38 = vector.extract_strided_slice %35 {offsets = [16, 0], sizes = [8, 256], strides = [1, 1]} : vector<24x256xf32> to vector<8x256xf32>
    %39 = vector.broadcast %1 : vector<8x1xf32> to vector<8x256xf32>
    %40 = arith.addf %37, %39 : vector<8x256xf32>
    %c16_i32_16 = arith.constant 16 : i32
    %41 = tpu.dynamic_rotate %36 by %c16_i32_16 dim 1 : vector<8x256xf32>, i32 -> vector<8x256xf32>
    %cst_17 = arith.constant 0.000000e+00 : f32
    %42 = vector.broadcast %cst_17 : f32 to vector<8x256xf32>
    %43 = arith.select %26, %41, %42 : vector<8x256xi1>, vector<8x256xf32>
    %44 = arith.addf %40, %43 : vector<8x256xf32>
    %c240_i32_18 = arith.constant 240 : i32
    %45 = tpu.dynamic_rotate %38 by %c240_i32_18 dim 1 : vector<8x256xf32>, i32 -> vector<8x256xf32>
    %cst_19 = arith.constant 0.000000e+00 : f32
    %46 = vector.broadcast %cst_19 : f32 to vector<8x256xf32>
    %47 = arith.select %28, %45, %46 : vector<8x256xi1>, vector<8x256xf32>
    %48 = arith.addf %44, %47 : vector<8x256xf32>
    %49 = vector.shape_cast %48 : vector<8x256xf32> to vector<1x8x256xf32>
    %cst_20 = arith.constant dense<0.000000e+00> : vector<1xf32>
    %50 = vector.multi_reduction <add>, %49, %cst_20 [1, 2] : vector<1x8x256xf32> to vector<1xf32>
    %51 = vector.shape_cast %50 : vector<1xf32> to vector<1x1x1xf32>
    %52 = vector.extract %51[0, 0, 0] : f32 from vector<1x1x1xf32>
    %53 = arith.mulf %48, %48 : vector<8x256xf32>
    %54 = vector.shape_cast %53 : vector<8x256xf32> to vector<1x8x256xf32>
    %cst_21 = arith.constant dense<0.000000e+00> : vector<1xf32>
    %55 = vector.multi_reduction <add>, %54, %cst_21 [1, 2] : vector<1x8x256xf32> to vector<1xf32>
    %56 = vector.shape_cast %55 : vector<1xf32> to vector<1x1x1xf32>
    %57 = vector.extract %56[0, 0, 0] : f32 from vector<1x1x1xf32>
    %cst_22 = arith.constant 4.8828125E-4 : f32
    %58 = arith.mulf %52, %cst_22 : f32
    %cst_23 = arith.constant 4.8828125E-4 : f32
    %59 = arith.mulf %57, %cst_23 : f32
    %60 = arith.mulf %58, %58 : f32
    %61 = arith.subf %59, %60 : f32
    %cst_24 = arith.constant 0.000000e+00 : f32
    %62 = arith.maximumf %61, %cst_24 : f32
    %cst_25 = arith.constant 9.99999993E-9 : f32
    %63 = arith.addf %62, %cst_25 : f32
    %64 = math.rsqrt %63 : f32
    %65 = vector.broadcast %64 : f32 to vector<8x1xf32>
    %66 = arith.mulf %2, %65 : vector<8x1xf32>
    %67 = vector.broadcast %58 : f32 to vector<8x1xf32>
    %68 = arith.mulf %67, %66 : vector<8x1xf32>
    %69 = arith.subf %3, %68 : vector<8x1xf32>
    %70 = vector.broadcast %66 : vector<8x1xf32> to vector<8x256xf32>
    %71 = arith.mulf %48, %70 : vector<8x256xf32>
    %72 = vector.broadcast %69 : vector<8x1xf32> to vector<8x256xf32>
    %73 = arith.addf %71, %72 : vector<8x256xf32>
    %cst_26 = arith.constant 0.000000e+00 : f32
    %74 = vector.broadcast %cst_26 : f32 to vector<8x256xf32>
    %75 = arith.cmpf oge, %73, %74 : vector<8x256xf32>
    %76 = vector.broadcast %4 : f32 to vector<8x256xf32>
    %77 = arith.mulf %76, %73 : vector<8x256xf32>
    %78 = arith.select %75, %73, %77 : vector<8x256xi1>, vector<8x256xf32>
    %c0_27 = arith.constant 0 : index
    %c0_28 = arith.constant 0 : index
    %c0_29 = arith.constant 0 : index
    %79 = vector.load %arg5[%c0_27, %c0_28, %c0_29] : memref<1x8x256xf32, #tpu.memory_space<vmem>>, vector<1x8x256xf32>
    %80 = vector.shape_cast %79 : vector<1x8x256xf32> to vector<8x256xf32>
    %81 = vector.shape_cast %78 : vector<8x256xf32> to vector<1x8x256xf32>
    tpu.vector_store %arg5[%c0_27, %c0_28, %c0_29], %81 {strides = array<i32>} : memref<1x8x256xf32, #tpu.memory_space<vmem>>, vector<1x8x256xf32>,
    return
  }
  func.func @transform_0(%arg0: i32) -> (i32, i32, i32) {
    %c0_i32 = arith.constant 0 : i32
    %c0_i32_0 = arith.constant 0 : i32
    %c0_i32_1 = arith.constant 0 : i32
    return %arg0, %c0_i32, %c0_i32_0 : i32, i32, i32
  }
  func.func @transform_1(%arg0: i32) -> (i32, i32) {
    %c0_i32 = arith.constant 0 : i32
    %c0_i32_0 = arith.constant 0 : i32
    %c0_i32_1 = arith.constant 0 : i32
    return %c0_i32, %c0_i32_0 : i32, i32
  }
  func.func @transform_2(%arg0: i32) -> (i32, i32) {
    %c0_i32 = arith.constant 0 : i32
    %c0_i32_0 = arith.constant 0 : i32
    %c0_i32_1 = arith.constant 0 : i32
    return %c0_i32, %c0_i32_0 : i32, i32
  }
  func.func @transform_3(%arg0: i32) -> i32 {
    %c0_i32 = arith.constant 0 : i32
    %c0_i32_0 = arith.constant 0 : i32
    return %c0_i32 : i32
  }
  func.func @transform_4(%arg0: i32) -> (i32, i32, i32) {
    %c0_i32 = arith.constant 0 : i32
    %c0_i32_0 = arith.constant 0 : i32
    %c0_i32_1 = arith.constant 0 : i32
    return %arg0, %c0_i32, %c0_i32_0 : i32, i32, i32
  }
}

</mosaic_0001>

<bundles_post_ra>
// kernel: spconv_forward.1
= control target key start
LH: loop header
LB: loop body
LE: loop exit
PB: predicated region body
PF: predicated region fallthrough
CT: control target
= control target key end

     0   :  { %s1095_s17 = smov 0   ;;  %s1199_s0 = inlined_call_operand.vmem [shape: f32[2,4,256], index: 0, kind: input, shape index: {}]   ;;  %s1200_s1 = inlined_call_operand.vmem [shape: f32[24,8], index: 1, kind: input, shape index: {}]   ;;  %s1201_s2 = inlined_call_operand.vmem [shape: f32[8,3], index: 2, kind: input, shape index: {}]   ;;  %s1202_s3 = inlined_call_operand.<no memory space> [shape: f32[1], index: 3, kind: input, shape index: {}]   ;;  %s1203_s4 = inlined_call_operand.vmem [shape: f32[2,8,256], index: 4, kind: output, shape index: {}]  }
   0x1   :  { %9 = sst [smem:[#allocation2]] %s1202_s3 }
   0x2 LB: > { %s979_s18 = sadd.s32 4294967295, %s1057_s17   ;;  %p983_p0 = scmp.ge.s32.totalorder %s1057_s17, 1  ;;  %s1057_s17 = sphi %s1095_s17, %s15_s17  }
   0x3   : > { %p163_p1 = scmp.lt.s32.totalorder %s1057_s17, 3 }
   0x5   : > { %p164_p2 = pnand %p983_p0, %p163_p1 }
   0x6   : > { %p189_p3 = scmp.lt.s32.totalorder (!%p164_p2), %s979_s18, 1  ;;  %v1059_v1 = vmov (!%p164_p2), 0.0   ;;  %s1060_s22 = smov (!%p164_p2), 1   ;;  %v1116_v3 = vld [vmem:[%s1201_s2] sm:$0xff] (!%p164_p2)  ;;  %v1061_v4 = vmov (!%p164_p2), 0   ;;  %v204_v5 = vlaneseq (!%p164_p2)  ;;  %vm259_vm0 = vcmask (!%p164_p2), 64512  }
   0x7   : > { %167 = sbr.rel (%p164_p2) target bundleno = 1047 (0x417), region = 36  ;;  %335 = vmatprep.mubr.f32.mxu1 (!%p164_p2), %v1059_v1  ;;  %624 = vmatprep.mubr.f32.mxu0 (!%p164_p2), %v1059_v1  ;;  %v199_v6 = vld [vmem:[%s1200_s1] sm:$0xff] (!%p164_p2)  ;;  %v200_v9 = vld [vmem:[%s1200_s1 + $0x8] sm:$0xff] (!%p164_p2)  ;;  %v201_v13 = vld [vmem:[%s1200_s1 + $0x10] sm:$0xff] (!%p164_p2)  ;;  %vm256_vm4 = vcmask (!%p164_p2), 1043456   ;;  %s1062_s5 = smov (!%p164_p2), 16  }
   0x8   : > { %1044 = vset.pattern.permute.xlu1 (!%p164_p2), %v1061_v4  ;;  %v1122_v7 = vand.u32 (!%p164_p2), 127, %v204_v5  ;;  %v261_v8 = vsel (!%p164_p2), %vm259_vm0, %v199_v6, 0  ;;  %v264_v11 = vsel (!%p164_p2), %vm259_vm0, %v200_v9, 0  ;;  %v267_v18 = vsel (!%p164_p2), %vm259_vm0, %v201_v13, 0  ;;  %s1063_s6 = smov (!%p164_p2), 112   ;;  %s1065_s13 = smov (!%p164_p2), 0.0  }
   0x9   : > { %834 = vperm.xlu1 (!%p164_p2), %1044, %v1116_v3   ;;  %v1127_v10 = vand.u32 (!%p164_p2), 4294901760, %v261_v8  ;;  %v1135_v14 = vand.u32 (!%p164_p2), 4294901760, %v264_v11  ;;  %v1147_v22 = vand.u32 (!%p164_p2), 4294901760, %v267_v18 }
   0xa   : > { %v1130_v12 = vadd.s32 (!%p164_p2), 128, %v1122_v7  ;;  %v211_v16 = vand.u32 (!%p164_p2), 15, %v1122_v7  ;;  %vm245_vm1 = vcmp.lt.s32.totalorder (!%p164_p2), %v1122_v7, 1  ;;  %vm843_vm5 = vcmp.lt.s32.totalorder (!%p164_p2), %v1122_v7, 16 }
   0xb   : > { %v1138_v15 = vsub.f32 (!%p164_p2), %v261_v8, %v1127_v10  ;;  %v1143_v20 = vsub.f32 (!%p164_p2), %v264_v11, %v1135_v14  ;;  %v1152_v30 = vsub.f32 (!%p164_p2), %v267_v18, %v1147_v22  ;;  %vm233_vm6 = vcmp.ge.s32.totalorder (!%p164_p2), %v1122_v7, 16 }
   0xc   : > { %v218_v17 = vand.u32 (!%p164_p2), 15, %v1130_v12  ;;  %vm231_vm2 = vcmp.eq.s32.totalorder (!%p164_p2), %v211_v16, 0  ;;  %vm854_vm7 = vcmp.lt.s32.totalorder (!%p164_p2), %v1122_v7, 112  ;;  %vm236_vm8 = vcmp.lt.s32.totalorder (!%p164_p2), %v1130_v12, 240 }
   0xd   : > { %v338_v21 = vand.u32 (!%p164_p2), 4294901760, %v1138_v15  ;;  %v349_v26 = vand.u32 (!%p164_p2), 4294901760, %v1143_v20  ;;  %v360_v39 = vand.u32 (!%p164_p2), 4294901760, %v1152_v30 }
   0xe   : > { %s1205_s18 = smov (!%p189_p3, %s979_s18), 1  ;;  %vm232_vm3 = vcmp.eq.s32.totalorder %v218_v17, 0 }
   0xf   : > { %s990_s3 = sshll.u32 %s1205_s18, 3  ;;  %v339_v29 = vsub.f32 %v1138_v15, %v338_v21  ;;  %v350_v35 = vsub.f32 %v1143_v20, %v349_v26  ;;  %v361_v45 = vsub.f32 %v1152_v30, %v360_v39  ;;  %s991_s19 = sshll.u32 %s1205_s18, 4 }
  0x10   : > { %s193_s21 = scalar_lea.vmem %s1199_s0, %s990_s3  ;;  %s203_s3 = sld [smem:[#allocation2]] }
  0x11   : > { %v237_v0 = vld [vmem:[%s193_s21] sm:$0xff]  ;;  %v340_v38 = vand.u32 4294901760, %v339_v29  ;;  %v351_v44 = vand.u32 4294901760, %v350_v35  ;;  %v362_v50 = vand.u32 4294901760, %v361_v45  ;;  %s198_s23 = scalar_lea.vmem %s1203_s4, %s991_s19 }
  0x12   : > { %241 = vrot.lane.b32.xlu0 %v237_v0, %s1060_s22  ;;  %v239_v2 = vcombine.high %v237_v0, %v237_v0 }
  0x16   : > { %243 = vrot.lane.b32.xlu0 %v239_v2, %s1060_s22 }
  0x84   : > { %v242_v19 = vpop.permute.xlu0 %241 }
  0x88   : > { %v244_v23 = vpop.permute.xlu0 %243  ;;  %v835_v6 = vpop.permute.xlu1 %834 }
  0x89   : > { %v246_v24 = vsel %vm245_vm1, %v242_v19, %v244_v23  ;;  %v247_v25 = vsel %vm245_vm1, %v244_v23, %v242_v19 }
  0x8a   : > { %v248_v27 = vsel %vm231_vm2, 0.0, %v247_v25  ;;  %v249_v28 = vsel %vm232_vm3, 0.0, %v246_v24 }
  0x8b   : > { %v252_v31 = vrot.slane %v248_v27, 4  ;;  %v253_v32 = vrot.slane %v249_v28, 4 }
  0x8d   : > { %v257_v33 = vsel %vm256_vm4, %v237_v0, %v252_v31  ;;  %v258_v34 = vsel %vm256_vm4, %v239_v2, %v253_v32 }
  0x8e   : > { %v269_v36 = vand.u32 4294901760, %v258_v34  ;;  %v271_v37 = vand.u32 4294901760, %v257_v33 }
  0x90   : > { %270 = vmatprep.subr.mxu1 %v269_v36  ;;  %559 = vmatprep.subr.mxu0 %v269_v36  ;;  %v370_v40 = vsub.f32 %v258_v34, %v269_v36  ;;  %v376_v41 = vsub.f32 %v257_v33, %v271_v37 }
  0x91   : > { %272 = vmatpush1.msra.mxu1 %v271_v37  ;;  %561 = vmatpush1.msra.mxu0 %v271_v37 }
  0x92   : > { %341 = vmatmul.mubr.f32.vlgmr.msra.gmra.mrb[0].mxu1 %v340_v38  ;;  %628 = vmatmul.mubr.f32.vlgmr.msra.gmra.mrb[0].mxu0 %v338_v21  ;;  %v371_v42 = vand.u32 4294901760, %v370_v40  ;;  %v377_v43 = vand.u32 4294901760, %v376_v41  ;;  %v1064_v38 = vmov 1  }
  0x93   : > { %346 = vmatprep.mubr.f32.mxu1 %v1059_v1  ;;  %633 = vmatprep.mubr.f32.mxu0 %v1059_v1 }
  0x94   : > { %655 = vmatprep.subr.mxu0 %v371_v42  ;;  %v372_v46 = vsub.f32 %v370_v40, %v371_v42  ;;  %v378_v47 = vsub.f32 %v376_v41, %v377_v43  ;;  %1045 = vset.pattern.permute.xlu1 %v1064_v38 }
  0x95   : > { %659 = vmatpush1.msra.mxu0 %v377_v43 }
  0x96   : > { %352 = vmatmul.mubr.f32.gmra.mrb[2].mxu1 %v351_v44  ;;  %637 = vmatmul.mubr.f32.gmra.mrb[2].mxu0 %v349_v26  ;;  %v373_v48 = vand.u32 4294901760, %v372_v46  ;;  %v379_v49 = vand.u32 4294901760, %v378_v47  ;;  %v1066_v44 = vmov 2  }
  0x97   : > { %745 = vmatprep.subr.mxu0 %v269_v36  ;;  %357 = vmatprep.mubr.f32.mxu1 %v1059_v1 }
  0x98   : > { %374 = vmatprep.subr.mxu1 %v373_v48  ;;  %642 = vmatprep.mubr.f32.mxu0 %v1059_v1 }
  0x99   : > { %380 = vmatpush1.msra.mxu1 %v379_v49  ;;  %1047 = vset.pattern.permute.xlu0 %v1066_v44 }
  0x9a   : > { %363 = vmatmul.mubr.f32.gmra.mrb[4].mxu1 %v362_v50  ;;  %467 = vmatprep.subr.mxu1 %v370_v40 }
  0x9b   : > { %646 = vmatmul.mubr.f32.gmra.mrb[4].mxu0 %v360_v39  ;;  %443 = vmatprep.mubr.f32.mxu1 %v1059_v1 }
  0x9c   : > { %722 = vmatprep.mubr.f32.mxu0 %v1059_v1 }
  0x9e   : > { %445 = vmatmul.mubr.f32.vlgmr.msra.gmra.mrb[0].mxu1 %v1127_v10 }
  0x9f   : > { %470 = vmatpush1.msra.mxu1 %v376_v41  ;;  %724 = vmatmul.mubr.f32.vlgmr.msra.gmra.mrb[0].mxu0 %v1127_v10 }
  0xa0   : > { %747 = vmatpush1.msra.mxu0 %v271_v37  ;;  %450 = vmatprep.mubr.f32.mxu1 %v1059_v1 }
  0xa1   : > { %729 = vmatprep.mubr.f32.mxu0 %v1059_v1 }
  0xa2   : > { %452 = vmatmul.mubr.f32.gmra.mrb[2].mxu1 %v1135_v14 }
  0xa3   : > { %731 = vmatmul.mubr.f32.gmra.mrb[2].mxu0 %v1135_v14  ;;  %457 = vmatprep.mubr.f32.mxu1 %v1059_v1 }
  0xa4   : > { %736 = vmatprep.mubr.f32.mxu0 %v1059_v1 }
  0xa6   : > { %459 = vmatmul.mubr.f32.gmra.mrb[4].mxu1 %v1147_v22 }
  0xa7   : > { %738 = vmatmul.mubr.f32.gmra.mrb[4].mxu0 %v1147_v22  ;;  %533 = vmatprep.mubr.f32.mxu1 %v1059_v1 }
  0xa8   : > { %810 = vmatprep.mubr.f32.mxu0 %v1059_v1 }
  0xaa   : > { %536 = vmatmul.mubr.f32.vlgmr.msra.gmra.mrb[0].mxu1 %v1138_v15 }
  0xab   : > { %812 = vmatmul.mubr.f32.vlgmr.msra.gmra.mrb[0].mxu0 %v1127_v10  ;;  %541 = vmatprep.mubr.f32.mxu1 %v1059_v1 }
  0xac   : > { %817 = vmatprep.mubr.f32.mxu0 %v1059_v1 }
  0xae   : > { %544 = vmatmul.mubr.f32.gmra.mrb[2].mxu1 %v1143_v20 }
  0xaf   : > { %819 = vmatmul.mubr.f32.gmra.mrb[2].mxu0 %v1135_v14  ;;  %549 = vmatprep.mubr.f32.mxu1 %v1059_v1 }
  0xb0   : > { %824 = vmatprep.mubr.f32.mxu0 %v1059_v1 }
  0xb2   : > { %552 = vmatmul.mubr.f32.gmra.mrb[4].mxu1 %v1152_v30 }
  0xb3   : > { %826 = vmatmul.mubr.f32.gmra.mrb[4].mxu0 %v1147_v22 }
 0x17d   : > { %v537_v51 = vpop.f32.mrb[0].mxu1 }
 0x17e   : > { %v813_v52 = vpop.f32.mrb[0].mxu0  ;;  %v539_v53 = vpop.f32.mrb[1].mxu1 }
 0x17f   : > { %v992_v54 = vadd.f32 %v813_v52, %v537_v51  ;;  %v815_v55 = vpop.f32.mrb[1].mxu0 }
 0x180   : > { %v993_v56 = vadd.f32 %v815_v55, %v539_v53 }
 0x181   : > { %839 = vrot.lane.b32.xlu1 %v992_v54, %s1062_s5  ;;  %v545_v57 = vpop.f32.mrb[2].mxu1  ;;  %v917_v54 = vstv %s203_s3 }
 0x182   : > { %v820_v58 = vpop.f32.mrb[2].mxu0  ;;  %841 = vrot.lane.b32.xlu0 %v993_v56, %s1062_s5  ;;  %v547_v59 = vpop.f32.mrb[3].mxu1 }
 0x183   : > { %v994_v60 = vadd.f32 %v820_v58, %v545_v57  ;;  %v822_v61 = vpop.f32.mrb[3].mxu0 }
 0x184   : > { %v995_v62 = vadd.f32 %v822_v61, %v547_v59 }
 0x185   : > { %v553_v63 = vpop.f32.mrb[4].mxu1  ;;  %v837_v13 = vadd.f32 %v994_v60, %v835_v6 }
 0x186   : > { %v827_v0 = vpop.f32.mrb[4].mxu0  ;;  %v555_v1 = vpop.f32.mrb[5].mxu1  ;;  %v838_v15 = vadd.f32 %v995_v62, %v835_v6 }
 0x187   : > { %v996_v2 = vadd.f32 %v827_v0, %v553_v63  ;;  %v829_v4 = vpop.f32.mrb[5].mxu0 }
 0x188   : > { %v997_v5 = vadd.f32 %v829_v4, %v555_v1 }
 0x189   : > { %850 = vrot.lane.b32.xlu1 %v996_v2, %s1063_s6 }
 0x18a   : > { %852 = vrot.lane.b32.xlu0 %v997_v5, %s1063_s6 }
 0x1f3   : > { %v840_v8 = vpop.permute.xlu1 %839 }
 0x1f4   : > { %v842_v9 = vpop.permute.xlu0 %841 }
 0x1f5   : > { %v845_v10 = vsel %vm843_vm5, %v842_v9, %v840_v8  ;;  %v844_v14 = vsel %vm843_vm5, %v840_v8, %v842_v9 }
 0x1f6   : > { %v846_v11 = vsel %vm233_vm6, %v845_v10, 0.0  ;;  %v849_v19 = vadd.f32 %v844_v14, %v838_v15 }
 0x1f7   : > { %v848_v17 = vadd.f32 %v846_v11, %v837_v13 }
 0x1fb   : > { %v851_v16 = vpop.permute.xlu1 %850 }
 0x1fc   : > { %v853_v18 = vpop.permute.xlu0 %852 }
 0x1fd   : > { %v855_v20 = vsel %vm854_vm7, %v851_v16, %v853_v18  ;;  %v856_v21 = vsel %vm854_vm7, %v853_v18, %v851_v16 }
 0x1fe   : > { %v858_v22 = vsel %vm236_vm8, %v856_v21, 0.0  ;;  %v859_v23 = vadd.f32 %v855_v20, %v848_v17 }
 0x1ff   : > { %v860_v24 = vadd.f32 %v858_v22, %v849_v19 }
 0x200   : > { %v871_v25 = vmul.f32 %v859_v23, %v859_v23 }
 0x201   : > { %v861_v26 = vadd.f32 %v860_v24, %v859_v23  ;;  %v872_v27 = vmul.f32 %v860_v24, %v860_v24 }
 0x203   : > { %862 = vadd.xlane.f32.xlu1 %v861_v26  ;;  %v873_v28 = vadd.f32 %v872_v27, %v871_v25 }
 0x205   : > { %874 = vadd.xlane.f32.xlu0 %v873_v28 }
 0x290   : > { %v863_v29 = vpop.xlane.xlu1 %862 }
 0x291   : > { %v864_v7 = vrot.slane %v863_v29, 4 }
 0x292   : > { %v875_v30 = vpop.xlane.xlu0 %874 }
 0x293   : > { %v865_v31 = vadd.f32 %v864_v7, %v863_v29  ;;  %v876_v32 = vrot.slane %v875_v30, 4 }
 0x295   : > { %v866_v12 = vrot.slane %v865_v31, 2  ;;  %v877_v33 = vadd.f32 %v876_v32, %v875_v30 }
 0x297   : > { %v878_v34 = vrot.slane %v877_v33, 2  ;;  %v867_v35 = vadd.f32 %v866_v12, %v865_v31 }
 0x299   : > { %v868_v36 = vrot.slane %v867_v35, 1  ;;  %v879_v37 = vadd.f32 %v878_v34, %v877_v33 }
 0x29b   : > { %v869_v39 = vadd.f32 %v868_v36, %v867_v35  ;;  %v880_v40 = vrot.slane %v879_v37, 1 }
 0x29d   : > { %1022 = vpush %v869_v39  ;;  %v881_v41 = vadd.f32 %v880_v40, %v879_v37 }
 0x29f   : > { %1024 = vpush %v881_v41 }
 0x2ce   : > { %s1023_s7 = spop %1022 }
 0x2cf   : > { %s883_s8 = smul.f32 0.00048828125, %s1023_s7 }
 0x2d0   : > { %s1025_s9 = spop %1024 }
 0x2d1   : > { %s885_s10 = smul.f32 %s883_s8, %s883_s8  ;;  %v894_v47 = vstv %s883_s8 }
 0x2d2   : > { %s884_s11 = smul.f32 0.00048828125, %s1025_s9 }
 0x2d4   : > { %s886_s12 = ssub.f32 %s884_s11, %s885_s10 }
 0x2d6   : > { %s887_s14 = smax.f32 %s1065_s13, %s886_s12 }
 0x2d7   : > { %s888_s15 = sadd.f32 1e-08, %s887_s14 }
 0x2d9   : > { %v889_v42 = vstv %s888_s15 }
 0x2da   : > { %1049 = vrsqrt.f32 %v889_v42 }
 0x2e4   : > { %v1050_v43 = vpop.eup %1049 }
 0x2e5   : > { %1026 = vpush %v1050_v43 }
 0x316   : > { %s1027_s16 = spop %1026 }
 0x317   : > { %v892_v45 = vstv %s1027_s16 }
 0x318   : > { %v893_v46 = vmul.f32 %v892_v45, %v1116_v3 }
 0x31a   : > { %v895_v48 = vmul.f32 %v894_v47, %v893_v46  ;;  %903 = vperm.xlu1 %1045, %v893_v46  }
 0x31c   : > { %897 = vrot.lane.b32.xlu0 %v895_v48, %s1060_s22 }
 0x31e   : > { %1046 = vset.pattern.permute.xlu1 %v1066_v44 }
 0x38e   : > { %v898_v49 = vpop.permute.xlu0 %897 }
 0x38f   : > { %v900_v50 = vsub.f32 %v1116_v3, %v898_v49 }
 0x391   : > { %910 = vperm.xlu1 %1046, %v900_v50  }
 0x399   : > { %v904_v51 = vpop.permute.xlu1 %903 }
 0x39a   : > { %v906_v52 = vmul.f32 %v904_v51, %v859_v23  ;;  %v907_v53 = vmul.f32 %v904_v51, %v860_v24 }
 0x410   : > { %v911_v55 = vpop.permute.xlu1 %910 }
 0x411   : > { %v913_v56 = vadd.f32 %v911_v55, %v906_v52  ;;  %v914_v57 = vadd.f32 %v911_v55, %v907_v53 }
 0x413   : > { %vm915_vm9 = vcmp.ge.f32.partialorder %v913_v56, 0.0  ;;  %vm916_vm10 = vcmp.ge.f32.partialorder %v914_v57, 0.0  ;;  %v918_v58 = vmul.f32 %v917_v54, %v913_v56  ;;  %v919_v59 = vmul.f32 %v917_v54, %v914_v57 }
 0x415   : > { %v920_v60 = vsel %vm915_vm9, %v913_v56, %v918_v58  ;;  %v921_v3 = vsel %vm916_vm10, %v914_v57, %v919_v59 }
 0x416   : > { %922 = vst [vmem:[%s198_s23] sm:$0xff] %v920_v60  ;;  %923 = vst [vmem:[%s198_s23 + $0x8] sm:$0xff] %v921_v3 }
 0x417 PF: > { %s15_s17 = sadd.s32 1, %s1057_s17  }
 0x418   : > { %p12_p4 = scmp.ge.s32.totalorder %s15_s17, 4  }
 0x41a   :  { %14 = sbr.rel (!%p12_p4) target bundleno = 2 (0x2), region = 66 }

</bundles_post_ra>
